<compile_context>
chip_gen: v6e
topology: v6e:2x2x1
jax: 0.10.0
libtpu: 0.0.40
codegen_flags: <defaults>
</compile_context>

<pallas_src>
import functools

import jax
import jax.numpy as jnp
from jax.experimental import pallas as pl
from jax.experimental.pallas import tpu as pltpu


def _round_up(v: int, m: int) -> int:
    return (v + m - 1) // m * m


def _cdiv(a: int, b: int) -> int:
    return (a + b - 1) // b


def _vmem_capacity_bytes() -> int:
    """Per-TensorCore VMEM capacity; conservative fallback (v7x = 64 MiB)."""
    try:
        return int(pltpu.get_tpu_info().vmem_capacity_bytes)
    except Exception:  # noqa: BLE001 - older jax / non-TPU tracing environments
        return 64 << 20


def object_encoder_kernel(x_ref, w_ref, b_ref, o_ref, *, d_out_p):
    # x_ref : (tm, D_in_p)        row tile of the input embeddings (MXU dtype)
    # w_ref : (D_in_p, 2*D_out_p) fused [W1 | W2], resident across the grid
    # b_ref : (1, 2*D_out_p)      fused [b1 | b2], float32
    # o_ref : (tm, D_out_p)       row tile of the (padded) output
    z = jnp.dot(x_ref[...], w_ref[...],
                preferred_element_type=jnp.float32) + b_ref[...]

    z1 = z[:, :d_out_p]          # sigmoid branch (D_out_p % 128 == 0 -> tile-aligned split)
    z2 = z[:, d_out_p:]          # tanh branch
    gated = jax.nn.sigmoid(z1) * jnp.tanh(z2)

    # torch.nn.functional.normalize(..., p=2, dim=1, eps=1e-12):
    #   x / max(||x||, 1e-12)  ==  x * rsqrt(max(sum(x^2), 1e-24))
    sumsq = jnp.sum(gated * gated, axis=-1, keepdims=True)
    inv = jax.lax.rsqrt(jnp.maximum(sumsq, 1e-24))
    o_ref[...] = (gated * inv).astype(o_ref.dtype)


# Cached result of whether this JAX/Mosaic version accepts single-buffered
# (pipeline_mode=pl.Buffered(1)) resident operands.
_SINGLE_BUFFER_OK = None


def object_encoder(x, w1, b1, w2, b2, *, tm_max=512, mxu_dtype=jnp.bfloat16):
    """x: (N, D_in); w1/w2: (D_in, D_out) (i.e. torch_weight.T); b1/b2: (D_out,).

    mxu_dtype: dtype for the matmul operands (bf16 by default, f32 accumulate).
               Pass None to keep the native input dtype on the MXU.
    """
    global _SINGLE_BUFFER_OK

    N, D_in = x.shape
    D_out = w1.shape[1]

    if mxu_dtype is None:
        mxu_dtype = x.dtype
    mxu_dtype = jnp.dtype(mxu_dtype)
    mxu_itemsize = mxu_dtype.itemsize
    out_itemsize = jnp.dtype(x.dtype).itemsize

    # Lane-dense padding of feature dims (zero columns contribute exactly 0 to
    # the gated product, so the per-row L2 norm is unchanged).
    D_in_p = _round_up(D_in, 128)
    D_out_p = _round_up(D_out, 128)

    # ------------------------------------------------------------------ VMEM
    vmem_budget = int(0.8 * _vmem_capacity_bytes())         # per TensorCore
    w_bytes = D_in_p * (2 * D_out_p) * mxu_itemsize         # resident fused weight
    b_bytes = (2 * D_out_p) * 4
    margin = 1 << 20
    # x/out row tiles are double-buffered by the pipeline.
    per_row = 2 * (D_in_p * mxu_itemsize + D_out_p * out_itemsize)
    avail = vmem_budget - w_bytes - b_bytes - margin         # weight single-buffered
    tm_cap = max(8, (avail // per_row) // 8 * 8) if avail > per_row * 8 else 8

    # ------------------------------------------------------ balanced row tiles
    n_rows = _round_up(N, 8)
    tm_target = max(8, min(tm_max, tm_cap))
    n_tiles = _cdiv(n_rows, tm_target)
    if n_tiles == 1 and n_rows >= 16:
        n_tiles = 2                      # keep both v7x TensorCores busy
    tm = _round_up(_cdiv(n_rows, n_tiles), 8)
    grid_m = _cdiv(n_rows, tm)
    N_p = grid_m * tm

    # ------------------------------------------------- pad/cast only if needed
    if N_p != N or D_in_p != D_in:
        x_p = jnp.zeros((N_p, D_in_p), mxu_dtype).at[:N, :D_in].set(
            x.astype(mxu_dtype))
    elif x.dtype != mxu_dtype:
        x_p = x.astype(mxu_dtype)
    else:
        x_p = x

    # Fused [W1 | W2] / [b1 | b2]; padding only when feature dims are ragged.
    # (Under jit these are constant-folded / reusable across calls.)
    if D_in_p == D_in and D_out_p == D_out:
        w_cat = jnp.concatenate(
            [w1.astype(mxu_dtype), w2.astype(mxu_dtype)], axis=1)
        b_cat = jnp.concatenate([b1, b2]).astype(jnp.float32).reshape(1, 2 * D_out)
    else:
        w_cat = jnp.zeros((D_in_p, 2 * D_out_p), mxu_dtype)
        w_cat = w_cat.at[:D_in, :D_out].set(w1.astype(mxu_dtype))
        w_cat = w_cat.at[:D_in, D_out_p:D_out_p + D_out].set(w2.astype(mxu_dtype))
        b_cat = jnp.zeros((1, 2 * D_out_p), jnp.float32)
        b_cat = b_cat.at[0, :D_out].set(b1.astype(jnp.float32))
        b_cat = b_cat.at[0, D_out_p:D_out_p + D_out].set(b2.astype(jnp.float32))

    # Grant enough VMEM even if the resident weight ends up double-buffered
    # (fallback path), but never more than the per-generation budget.
    vmem_need = 2 * w_bytes + 2 * b_bytes + per_row * tm + margin
    vmem_limit = int(min(max(vmem_need, 32 << 20), vmem_budget))

    cost = pl.CostEstimate(
        flops=2 * N_p * D_in_p * (2 * D_out_p),
        transcendentals=3 * N_p * D_out_p + N_p,   # sigmoid(~2) + tanh per elem, rsqrt per row
        bytes_accessed=(N_p * D_in_p * mxu_itemsize + w_bytes + b_bytes
                        + N_p * D_out_p * out_itemsize),
    )

    def _run(single_buffer_resident):
        x_spec = pl.BlockSpec((tm, D_in_p), lambda i: (i, 0))
        if single_buffer_resident:
            # Grid-invariant operands: never re-fetched, so a second pipeline
            # buffer is pure VMEM waste (matters most on v7x's 64 MiB VMEM).
            w_spec = pl.BlockSpec((D_in_p, 2 * D_out_p), lambda i: (0, 0),
                                  pipeline_mode=pl.Buffered(1))
            b_spec = pl.BlockSpec((1, 2 * D_out_p), lambda i: (0, 0),
                                  pipeline_mode=pl.Buffered(1))
        else:
            w_spec = pl.BlockSpec((D_in_p, 2 * D_out_p), lambda i: (0, 0))
            b_spec = pl.BlockSpec((1, 2 * D_out_p), lambda i: (0, 0))

        return pl.pallas_call(
            functools.partial(object_encoder_kernel, d_out_p=D_out_p),
            out_shape=jax.ShapeDtypeStruct((N_p, D_out_p), x.dtype),
            grid_spec=pltpu.PrefetchScalarGridSpec(
                num_scalar_prefetch=0,
                grid=(grid_m,),
                in_specs=[x_spec, w_spec, b_spec],
                out_specs=pl.BlockSpec((tm, D_out_p), lambda i: (i, 0)),
            ),
            compiler_params=pltpu.CompilerParams(
                dimension_semantics=("parallel",),
                vmem_limit_bytes=vmem_limit,
            ),
            cost_estimate=cost,
        )(x_p, w_cat, b_cat)

    if _SINGLE_BUFFER_OK is None:
        try:
            out_p = _run(True)
            _SINGLE_BUFFER_OK = True
        except Exception:  # noqa: BLE001 - Buffered(1) unsupported on this jax
            out_p = _run(False)
            _SINGLE_BUFFER_OK = False
    else:
        out_p = _run(_SINGLE_BUFFER_OK)

    if N_p != N or D_out_p != D_out:
        return out_p[:N, :D_out]
    return out_p


def object_encoder_ref(x, w1, b1, w2, b2):
    """Pure-JAX reference mirroring the PyTorch forward (f32 throughout)."""
    xf = x.astype(jnp.float32)
    z1 = xf @ w1.astype(jnp.float32) + b1.astype(jnp.float32)
    z2 = xf @ w2.astype(jnp.float32) + b2.astype(jnp.float32)
    gated = jax.nn.sigmoid(z1) * jnp.tanh(z2)
    norm = jnp.sqrt(jnp.sum(gated * gated, axis=1, keepdims=True))
    return (gated / jnp.maximum(norm, 1e-12)).astype(x.dtype)


if __name__ == "__main__":
    def make_inputs(key, n, d_in, d_out):
        kx, kw1, kb1, kw2, kb2 = jax.random.split(key, 5)
        x = jax.random.normal(kx, (n, d_in), dtype=jnp.float32)
        bound = 1.0 / (d_in ** 0.5)      # nn.Linear-style init, weights kept as W.T
        w1 = jax.random.uniform(kw1, (d_in, d_out), jnp.float32, -bound, bound)
        b1 = jax.random.uniform(kb1, (d_out,), jnp.float32, -bound, bound)
        w2 = jax.random.uniform(kw2, (d_in, d_out), jnp.float32, -bound, bound)
        b2 = jax.random.uniform(kb2, (d_out,), jnp.float32, -bound, bound)
        return x, w1, b1, w2, b2

    k1, k2 = jax.random.split(jax.random.PRNGKey(0))

    # Case 1: module-sized small shape (16 embeddings, 32 -> 32); feature dims
    # need lane padding to 128.
    x, w1, b1, w2, b2 = make_inputs(k1, 16, 32, 32)
    ref = object_encoder_ref(x, w1, b1, w2, b2)

    # f32 MXU operands: must match the f32 reference tightly.
    out_f32 = jax.block_until_ready(object_encoder(x, w1, b1, w2, b2, mxu_dtype=None))
    assert out_f32.shape == (16, 32)
    assert jnp.allclose(out_f32, ref, atol=1e-5, rtol=1e-5)

    # Default bf16 MXU operands (f32 accumulation): relaxed tolerance.
    out_bf16 = jax.block_until_ready(object_encoder(x, w1, b1, w2, b2))
    assert out_bf16.shape == (16, 32)
    assert jnp.allclose(out_bf16, ref, atol=2e-2, rtol=2e-2)

    # Case 2: lane-aligned shape — exercises the no-pad fast path, balanced row
    # tiles and the >=2-grid-step (megacore) split.
    x, w1, b1, w2, b2 = make_inputs(k2, 272, 256, 128)
    ref = object_encoder_ref(x, w1, b1, w2, b2)
    out = jax.block_until_ready(object_encoder(x, w1, b1, w2, b2))
    assert out.shape == (272, 128)
    assert jnp.allclose(out, ref, atol=2e-2, rtol=2e-2)

    print("KERNEL_OK")
</pallas_src>

<mosaic_0001>
module attributes {stable_mosaic.version = 11 : i64} {
  func.func @object_encoder_kernel(%arg0: i32, %arg1: memref<8x128xf32, #tpu.memory_space<vmem>>, %arg2: memref<128x256xf32, #tpu.memory_space<vmem>>, %arg3: memref<1x256xf32, #tpu.memory_space<vmem>>, %arg4: memref<8x128xf32, #tpu.memory_space<vmem>>) attributes {dimension_semantics = [#tpu.dimension_semantics<parallel>], iteration_bounds = array<i64: 2>, scalar_prefetch = 0 : i64, scratch_operands = 0 : i64, tpu.core_type = #tpu.core_type<tc>, window_params = [{transform_indices = @transform_0, window_bounds = array<i64: 8, 128>}, {pipeline_mode = #tpu.pipeline_mode<synchronous>, transform_indices = @transform_1, window_bounds = array<i64: 128, 256>}, {pipeline_mode = #tpu.pipeline_mode<synchronous>, transform_indices = @transform_2, window_bounds = array<i64: 1, 256>}, {transform_indices = @transform_3, window_bounds = array<i64: 8, 128>}]} {
    %c0 = arith.constant 0 : index
    %c0_0 = arith.constant 0 : index
    %0 = vector.load %arg1[%c0, %c0_0] : memref<8x128xf32, #tpu.memory_space<vmem>>, vector<8x128xf32>
    %c0_1 = arith.constant 0 : index
    %c0_2 = arith.constant 0 : index
    %1 = vector.load %arg2[%c0_1, %c0_2] : memref<128x256xf32, #tpu.memory_space<vmem>>, vector<128x256xf32>
    %cst = arith.constant dense<0.000000e+00> : vector<8x256xf32>
    %2 = tpu.matmul %0, %1, %cst {dimension_numbers = #tpu.dot_dimension_numbers<[1], [0], [0], [1], [0, 0, 1, 1], [], []>} : vector<8x128xf32>, vector<128x256xf32>, vector<8x256xf32> -> vector<8x256xf32>
    %c0_3 = arith.constant 0 : index
    %c0_4 = arith.constant 0 : index
    %3 = vector.load %arg3[%c0_3, %c0_4] : memref<1x256xf32, #tpu.memory_space<vmem>>, vector<1x256xf32>
    %4 = vector.broadcast %3 : vector<1x256xf32> to vector<8x256xf32>
    %5 = arith.addf %2, %4 : vector<8x256xf32>
    %6 = vector.extract_strided_slice %5 {offsets = [0, 0], sizes = [8, 128], strides = [1, 1]} : vector<8x256xf32> to vector<8x128xf32>
    %7 = vector.extract_strided_slice %5 {offsets = [0, 128], sizes = [8, 128], strides = [1, 1]} : vector<8x256xf32> to vector<8x128xf32>
    %8 = arith.negf %6 : vector<8x128xf32>
    %9 = math.exp %8 : vector<8x128xf32>
    %cst_5 = arith.constant 1.000000e+00 : f32
    %10 = vector.broadcast %cst_5 : f32 to vector<8x128xf32>
    %11 = arith.addf %10, %9 : vector<8x128xf32>
    %12 = arith.divf %10, %11 : vector<8x128xf32>
    %13 = math.tanh %7 : vector<8x128xf32>
    %14 = arith.mulf %12, %13 : vector<8x128xf32>
    %15 = arith.mulf %14, %14 : vector<8x128xf32>
    %cst_6 = arith.constant dense<0.000000e+00> : vector<8xf32>
    %16 = vector.multi_reduction <add>, %15, %cst_6 [1] : vector<8x128xf32> to vector<8xf32>
    %17 = vector.shape_cast %16 : vector<8xf32> to vector<8x1xf32>
    %cst_7 = arith.constant 1.000000e-24 : f32
    %18 = vector.broadcast %cst_7 : f32 to vector<8x1xf32>
    %19 = arith.maximumf %17, %18 : vector<8x1xf32>
    %20 = math.rsqrt %19 : vector<8x1xf32>
    %21 = vector.broadcast %20 : vector<8x1xf32> to vector<8x128xf32>
    %22 = arith.mulf %14, %21 : vector<8x128xf32>
    %c0_8 = arith.constant 0 : index
    %c0_9 = arith.constant 0 : index
    %23 = vector.load %arg4[%c0_8, %c0_9] : memref<8x128xf32, #tpu.memory_space<vmem>>, vector<8x128xf32>
    tpu.vector_store %arg4[%c0_8, %c0_9], %22 {strides = array<i32>} : memref<8x128xf32, #tpu.memory_space<vmem>>, vector<8x128xf32>,
    return
  }
  func.func @transform_0(%arg0: i32) -> (i32, i32) {
    %c0_i32 = arith.constant 0 : i32
    %c0_i32_0 = arith.constant 0 : i32
    return %arg0, %c0_i32 : i32, i32
  }
  func.func @transform_1(%arg0: i32) -> (i32, i32) {
    %c0_i32 = arith.constant 0 : i32
    %c0_i32_0 = arith.constant 0 : i32
    %c0_i32_1 = arith.constant 0 : i32
    return %c0_i32, %c0_i32_0 : i32, i32
  }
  func.func @transform_2(%arg0: i32) -> (i32, i32) {
    %c0_i32 = arith.constant 0 : i32
    %c0_i32_0 = arith.constant 0 : i32
    %c0_i32_1 = arith.constant 0 : i32
    return %c0_i32, %c0_i32_0 : i32, i32
  }
  func.func @transform_3(%arg0: i32) -> (i32, i32) {
    %c0_i32 = arith.constant 0 : i32
    %c0_i32_0 = arith.constant 0 : i32
    return %arg0, %c0_i32 : i32, i32
  }
}

module attributes {stable_mosaic.version = 11 : i64} {
  func.func @object_encoder_kernel(%arg0: i32, %arg1: memref<8x128xf32, #tpu.memory_space<vmem>>, %arg2: memref<128x256xf32, #tpu.memory_space<vmem>>, %arg3: memref<1x256xf32, #tpu.memory_space<vmem>>, %arg4: memref<8x128xf32, #tpu.memory_space<vmem>>) attributes {dimension_semantics = [#tpu.dimension_semantics<parallel>], iteration_bounds = array<i64: 2>, scalar_prefetch = 0 : i64, scratch_operands = 0 : i64, tpu.core_type = #tpu.core_type<tc>, window_params = [{transform_indices = @transform_0, window_bounds = array<i64: 8, 128>}, {pipeline_mode = #tpu.pipeline_mode<synchronous>, transform_indices = @transform_1, window_bounds = array<i64: 128, 256>}, {pipeline_mode = #tpu.pipeline_mode<synchronous>, transform_indices = @transform_2, window_bounds = array<i64: 1, 256>}, {transform_indices = @transform_3, window_bounds = array<i64: 8, 128>}]} {
    %c0 = arith.constant 0 : index
    %c0_0 = arith.constant 0 : index
    %0 = vector.load %arg1[%c0, %c0_0] : memref<8x128xf32, #tpu.memory_space<vmem>>, vector<8x128xf32>
    %c0_1 = arith.constant 0 : index
    %c0_2 = arith.constant 0 : index
    %1 = vector.load %arg2[%c0_1, %c0_2] : memref<128x256xf32, #tpu.memory_space<vmem>>, vector<128x256xf32>
    %cst = arith.constant dense<0.000000e+00> : vector<8x256xf32>
    %2 = tpu.matmul %0, %1, %cst {dimension_numbers = #tpu.dot_dimension_numbers<[1], [0], [0], [1], [0, 0, 1, 1], [], []>} : vector<8x128xf32>, vector<128x256xf32>, vector<8x256xf32> -> vector<8x256xf32>
    %c0_3 = arith.constant 0 : index
    %c0_4 = arith.constant 0 : index
    %3 = vector.load %arg3[%c0_3, %c0_4] : memref<1x256xf32, #tpu.memory_space<vmem>>, vector<1x256xf32>
    %4 = vector.broadcast %3 : vector<1x256xf32> to vector<8x256xf32>
    %5 = arith.addf %2, %4 : vector<8x256xf32>
    %6 = vector.extract_strided_slice %5 {offsets = [0, 0], sizes = [8, 128], strides = [1, 1]} : vector<8x256xf32> to vector<8x128xf32>
    %7 = vector.extract_strided_slice %5 {offsets = [0, 128], sizes = [8, 128], strides = [1, 1]} : vector<8x256xf32> to vector<8x128xf32>
    %8 = arith.negf %6 : vector<8x128xf32>
    %9 = math.exp %8 : vector<8x128xf32>
    %cst_5 = arith.constant 1.000000e+00 : f32
    %10 = vector.broadcast %cst_5 : f32 to vector<8x128xf32>
    %11 = arith.addf %10, %9 : vector<8x128xf32>
    %12 = arith.divf %10, %11 : vector<8x128xf32>
    %13 = math.tanh %7 : vector<8x128xf32>
    %14 = arith.mulf %12, %13 : vector<8x128xf32>
    %15 = arith.mulf %14, %14 : vector<8x128xf32>
    %cst_6 = arith.constant dense<0.000000e+00> : vector<8xf32>
    %16 = vector.multi_reduction <add>, %15, %cst_6 [1] : vector<8x128xf32> to vector<8xf32>
    %17 = vector.shape_cast %16 : vector<8xf32> to vector<8x1xf32>
    %cst_7 = arith.constant 1.000000e-24 : f32
    %18 = vector.broadcast %cst_7 : f32 to vector<8x1xf32>
    %19 = arith.maximumf %17, %18 : vector<8x1xf32>
    %20 = math.rsqrt %19 : vector<8x1xf32>
    %21 = vector.broadcast %20 : vector<8x1xf32> to vector<8x128xf32>
    %22 = arith.mulf %14, %21 : vector<8x128xf32>
    %c0_8 = arith.constant 0 : index
    %c0_9 = arith.constant 0 : index
    %23 = vector.load %arg4[%c0_8, %c0_9] : memref<8x128xf32, #tpu.memory_space<vmem>>, vector<8x128xf32>
    tpu.vector_store %arg4[%c0_8, %c0_9], %22 {strides = array<i32>} : memref<8x128xf32, #tpu.memory_space<vmem>>, vector<8x128xf32>,
    return
  }
  func.func @transform_0(%arg0: i32) -> (i32, i32) {
    %c0_i32 = arith.constant 0 : i32
    %c0_i32_0 = arith.constant 0 : i32
    return %arg0, %c0_i32 : i32, i32
  }
  func.func @transform_1(%arg0: i32) -> (i32, i32) {
    %c0_i32 = arith.constant 0 : i32
    %c0_i32_0 = arith.constant 0 : i32
    %c0_i32_1 = arith.constant 0 : i32
    return %c0_i32, %c0_i32_0 : i32, i32
  }
  func.func @transform_2(%arg0: i32) -> (i32, i32) {
    %c0_i32 = arith.constant 0 : i32
    %c0_i32_0 = arith.constant 0 : i32
    %c0_i32_1 = arith.constant 0 : i32
    return %c0_i32, %c0_i32_0 : i32, i32
  }
  func.func @transform_3(%arg0: i32) -> (i32, i32) {
    %c0_i32 = arith.constant 0 : i32
    %c0_i32_0 = arith.constant 0 : i32
    return %arg0, %c0_i32 : i32, i32
  }
}

</mosaic_0001>

<bundles_post_ra>
// kernel: tpu_custom_call.1
= control target key start
LH: loop header
LB: loop body
LE: loop exit
PB: predicated region body
PF: predicated region fallthrough
CT: control target
= control target key end

     0   :  { %8 = vsyncpa [#allocation3], 0  ;;  %s823_s0 = inlined_call_operand.hbm [shape: f32[16,128], index: 0, kind: input, shape index: {}]   ;;  %s824_s1 = inlined_call_operand.hbm [shape: f32[128,256], index: 1, kind: input, shape index: {}]   ;;  %s825_s2 = inlined_call_operand.vmem [shape: f32[1,256], index: 2, kind: input, shape index: {}]   ;;  %s826_s3 = inlined_call_operand.hbm [shape: f32[16,128], index: 3, kind: output, shape index: {}]  }
   0x1   :  { %10 = vsyncpa [#allocation3 + $0x1], 0 }
   0x2   :  { %11 = vsyncpa [#allocation6], 0 }
   0x3   :  { %12 = vsyncpa [#allocation4], 0 }
   0x4   :  { %14 = vsyncpa [#allocation4 + $0x1], 0  ;;  %s659_s12 = smov 0   ;;  %s661_s13 = smov 0  }
   0x5   :  { %s663_s14 = smov 0   ;;  %s665_s15 = smov 0  }
   0x6 LB: > { %s680_s16 = sadd.s32 4294967295, %s631_s15   ;;  %s426_s17 = sadd.s32 4294967294, %s631_s15   ;;  %s631_s15 = sphi %s665_s15, %s848_s15   ;;  %s627_s14 = sphi %s663_s14, %s847_s14   ;;  %s623_s13 = sphi %s661_s13, %s846_s13   ;;  %s619_s12 = sphi %s659_s12, %s845_s12  }
   0x7   : > { %p40_p0 = scmp.ne.s32.totalorder %s623_s13, %s619_s12  ;;  %p827_p1 = scmp.eq.s32.totalorder %s680_s16, 0 }
   0x8   : > { %p112_p3 = scmp.eq.s32.totalorder %s426_s17, 1  ;;  %p427_p5 = scmp.ge.s32.totalorder %s631_s15, 1 }
   0x9   : > { %p689_p4 = por %p827_p1, %p40_p0  ;;  %p119_p7 = scmp.lt.s32.totalorder %s631_s15, 3 }
   0xa   : > { %p694_p6 = por %p112_p3, %p40_p0  ;;  %s633_s21 = smov [#allocation5]  }
   0xb   : > { %s831_s18 = scalar_select %p689_p4, 1, 0 }
   0xc   : > { %s832_s19 = scalar_select %p694_p6, 1, 0 }
   0xd   : > { %p699_p8 = pnand %p427_p5, %p119_p7  ;;  %s131_s22 = sshll.u32 %s633_s21, 4  ;;  %s132_s22 = int_to_ptr.vmem [resolvable:$true] %s131_s22 }
   0xe   : > { %s713_s24 = sadd.s32 1, %s631_s15   ;;  %s27_s25 = sadd.s32 1, %s627_s14 }
   0xf   : > { %s833_s20 = scalar_select %p699_p8, 1, 0 }
  0x10   : > { %p449_p9 = pneg %p699_p8  ;;  %s24_s26 = ssub.s32 %s631_s15, %s713_s24 }
  0x11   : > { %s520_s27 = scalar_lea.vmem %s132_s22, 4096  ;;  %p528_p5 = scmp.lt.s32.totalorder %s132_s22, %s132_s22 }
  0x12   : > { %p708_p11 = pnand %p449_p9, %p827_p1  ;;  %p521_p13 = scmp.ne.s32.totalorder %s132_s22, %s520_s27 }
  0x13   : > { %p529_p7 = scmp.lt.s32.totalorder %s520_s27, %s520_s27 }
  0x14   : > { %p511_p12 = pneg %p708_p11 }
  0x15   : > { %p530_p10 = por %p529_p7, %p528_p5 }
  0x16   : > { %p523_p0 = pnand %p521_p13, %p511_p12 }
  0x18   : > { %p524_p3 = pneg %p523_p0 }
  0x1a   : > { %p531_p2 = pnand %p530_p10, %p524_p3 }
  0x1c   : > { %534 = shalt.err (!%p531_p2)
}
  0x1d   : > { %s634_s28 = smov 256   ;;  %s635_s29 = smov 16  }
  0x1e   : > { %452 = dma.hbm_to_vmem [thread:$0]  (!%p708_p11), %s824_s1, 4096, %s132_s22, [#allocation6], %s634_s28, %s634_s28, %s635_s29  }
  0x1f   : > { %p25_p9 = scmp.eq.s32.totalorder %s24_s26, 0  ;;  %p34_p12 = scmp.ne.s32.totalorder %s627_s14, %s623_s13 }
  0x20   : > { %p35_p10 = scmp.eq.s32.totalorder %s631_s15, 0  ;;  %p462_p2 = scmp.lt.s32.totalorder %s631_s15, 2 }
  0x21   : > { %s730_s5 = scalar_select %p25_p9, %s627_s14, %s27_s25  }
  0x22   : > { %p36_p13 = por %p35_p10, %p34_p12  ;;  %p835_p0 = scmp.eq.s32.totalorder %s680_s16, 1 }
  0x23   : > { %s148_s7 = sand.u32 1, %s627_s14   ;;  %s431_s8 = sshll.u32 %s631_s15, 7 }
  0x24   : > { %p734_p3 = por %p835_p0, %p34_p12  ;;  %s430_s9 = sshll.u32 %s148_s7, 3 }
  0x25   : > { %s743_s17 = scalar_lea.hbm %s823_s0, %s431_s8  ;;  %s152_s21 = scalar_lea.vmem [#allocation2], %s430_s9 }
  0x26   : > { %s836_s6 = scalar_select %p734_p3, 1, 0 }
  0x27   : > { %s159_s22 = sshll.u32 %s152_s21, 4  ;;  %p745_p11 = pnand %p462_p2, %p36_p13  ;;  %s160_s22 = int_to_ptr.vmem [resolvable:$true] %s159_s22 }
  0x28   : > { %s149_s25 = scalar_lea.sflag [#allocation3], %s148_s7  ;;  %s535_s26 = scalar_lea.hbm %s743_s17, 128 }
  0x29   : > { %p536_p5 = scmp.ne.s32.totalorder %s743_s17, %s535_s26  ;;  %p537_p7 = pneg %p745_p11 }
  0x2a   : > { %s540_s29 = scalar_lea.hbm %s823_s0, 256  ;;  %p541_p10 = scmp.lt.s32.totalorder %s743_s17, %s823_s0 }
  0x2b   : > { %p538_p9 = pnand %p537_p7, %p536_p5  ;;  %p542_p2 = scmp.lt.s32.totalorder %s540_s29, %s535_s26 }
  0x2d   : > { %p539_p12 = pneg %p538_p9  ;;  %p543_p13 = por %p542_p2, %p541_p10 }
  0x2f   : > { %p544_p0 = pnand %p543_p13, %p539_p12 }
  0x31   : > { %547 = shalt.err (!%p544_p0)
}
  0x32   : > { %s548_s8 = scalar_lea.vmem %s160_s22, 128  ;;  %s636_s7 = smov [#allocation2]  }
  0x33   : > { %p549_p1 = scmp.ne.s32.totalorder %s160_s22, %s548_s8  ;;  %s553_s9 = sshll.u32 %s636_s7, 4  ;;  %s554_s9 = int_to_ptr.vmem [resolvable:$false] %s553_s9 }
  0x34   : > { %s555_s10 = scalar_lea.vmem %s554_s9, 256  ;;  %p556_p5 = scmp.lt.s32.totalorder %s160_s22, %s554_s9 }
  0x35   : > { %p551_p6 = pnand %p549_p1, %p537_p7  ;;  %p557_p9 = scmp.lt.s32.totalorder %s555_s10, %s548_s8 }
  0x37   : > { %p552_p3 = pneg %p551_p6  ;;  %p558_p4 = por %p557_p9, %p556_p5 }
  0x39   : > { %p559_p8 = pnand %p558_p4, %p552_p3 }
  0x3b   : > { %562 = shalt.err (!%p559_p8)
}
  0x3c   : > { %456 = dma.hbm_to_vmem [thread:$0]  (!%p745_p11), %s743_s17, 128, %s160_s22, %s149_s25  }
  0x3d   : > { %p838_p12 = scmp.ne.s32.totalorder %s833_s20, 0 }
  0x3e   : > { %s766_s11 = sand.u32 (!%p838_p12), 1, %s623_s13   ;;  %p839_p1 = scmp.ne.s32.totalorder (!%p838_p12), %s831_s18, 0 }
  0x3f   : > { %168 = sbr.rel (%p838_p12) target bundleno = 505 (0x1f9), region = 32  ;;  %s433_s21 = sshll.u32 (!%p838_p12), %s766_s11, 3 }
  0x40   : > { %s171_s26 = scalar_lea.sflag (!%p838_p12), [#allocation3], %s766_s11  ;;  %s772_s27 = scalar_lea.vmem (!%p838_p12), [#allocation2], %s433_s21 }
  0x44   : > { %606 = dma.done.wait (%p839_p1), %s171_s26, 128  }
  0x45   : > { %608 = vsyncadd (%p839_p1), %s171_s26, 4294967168  ;;  %p840_p4 = scmp.eq.s32.totalorder %s680_s16, 0 }
  0x47   : > { %610 = dma.done.wait (%p840_p4), [#allocation6], 4096   ;;  %p841_p6 = pmov %p840_p4 }
  0x48   : > { %v637_v0 = vmov 0.0   ;;  %v233_v1 = vld [vmem:[#allocation5 + $0xf8] sm:$0xff]  ;;  %v232_v2 = vld [vmem:[#allocation5 + $0xf0] sm:$0xff]  ;;  %v231_v3 = vld [vmem:[#allocation5 + $0xe8] sm:$0xff]  ;;  %v236_v34 = vlaneseq  ;;  %s438_s17 = sshll.u32 %s680_s16, 7  ;;  %s200_s22 = scalar_lea.vmem [#allocation7], %s433_s21 }
  0x49   : > { %612 = vsyncadd (%p841_p6), [#allocation6], 4294963200  ;;  %310 = vmatprep.mubr.f32.mxu0 %v637_v0  ;;  %246 = vmatprep.subr.mxu0 %v233_v1  ;;  %v230_v4 = vld [vmem:[#allocation5 + $0xe0] sm:$0xff]  ;;  %v229_v5 = vld [vmem:[#allocation5 + $0xd8] sm:$0xff]  ;;  %s346_s23 = sshll.u32 %s200_s22, 4  ;;  %s344_s29 = scalar_lea.hbm %s826_s3, %s438_s17  ;;  %s347_s23 = int_to_ptr.vmem [resolvable:$true] %s346_s23 }
  0x4a   : > { %247 = vmatpush1.msra.mxu0 %v232_v2  ;;  %v228_v6 = vld [vmem:[#allocation5 + $0xd0] sm:$0xff]  ;;  %v227_v7 = vld [vmem:[#allocation5 + $0xc8] sm:$0xff]  ;;  %v226_v8 = vld [vmem:[#allocation5 + $0xc0] sm:$0xff]  ;;  %v237_v35 = vshrl.u32 %v236_v34, 7  ;;  %s333_s30 = scalar_lea.sflag [#allocation4], %s766_s11  ;;  %s563_s4 = scalar_lea.vmem %s347_s23, 128 }
  0x4b   : > { %248 = vmatprep.subr.mxu0 %v231_v3  ;;  %v225_v9 = vld [vmem:[#allocation5 + $0xb8] sm:$0xff]  ;;  %v224_v10 = vld [vmem:[#allocation5 + $0xb0] sm:$0xff]  ;;  %v223_v11 = vld [vmem:[#allocation5 + $0xa8] sm:$0xff]  ;;  %p564_p8 = scmp.ne.s32.totalorder %s347_s23, %s563_s4  ;;  %p842_p3 = scmp.ne.s32.totalorder %s836_s6, 0 }
  0x4c   : > { %249 = vmatpush1.msra.mxu0 %v230_v4  ;;  %v222_v12 = vld [vmem:[#allocation5 + $0xa0] sm:$0xff]  ;;  %v221_v13 = vld [vmem:[#allocation5 + $0x98] sm:$0xff]  ;;  %v220_v14 = vld [vmem:[#allocation5 + $0x90] sm:$0xff]  ;;  %v238_v36 = vsub.s32 0, %v237_v35  ;;  %v242_v42 = vsub.s32 1, %v237_v35  ;;  %s638_s8 = smov [#allocation7]  }
  0x4d   : > { %250 = vmatprep.subr.mxu0 %v229_v5  ;;  %v219_v15 = vld [vmem:[#allocation5 + $0x88] sm:$0xff]  ;;  %v218_v16 = vld [vmem:[#allocation5 + $0x80] sm:$0xff]  ;;  %v217_v17 = vld [vmem:[#allocation5 + $0x78] sm:$0xff]  ;;  %p565_p11 = pnand %p564_p8, %p842_p3  ;;  %s567_s7 = sshll.u32 %s638_s8, 4  ;;  %s568_s7 = int_to_ptr.vmem [resolvable:$false] %s567_s7 }
  0x4e   : > { %251 = vmatpush1.msra.mxu0 %v228_v6  ;;  %v216_v18 = vld [vmem:[#allocation5 + $0x70] sm:$0xff]  ;;  %v215_v19 = vld [vmem:[#allocation5 + $0x68] sm:$0xff]  ;;  %v214_v20 = vld [vmem:[#allocation5 + $0x60] sm:$0xff]  ;;  %s569_s16 = scalar_lea.vmem %s568_s7, 256  ;;  %p570_p10 = scmp.lt.s32.totalorder %s347_s23, %s568_s7 }
  0x4f   : > { %252 = vmatprep.subr.mxu0 %v227_v7  ;;  %v213_v21 = vld [vmem:[#allocation5 + $0x58] sm:$0xff]  ;;  %v212_v22 = vld [vmem:[#allocation5 + $0x50] sm:$0xff]  ;;  %v211_v23 = vld [vmem:[#allocation5 + $0x48] sm:$0xff]  ;;  %p566_p7 = pneg %p565_p11  ;;  %p571_p2 = scmp.lt.s32.totalorder %s569_s16, %s563_s4 }
  0x50   : > { %253 = vmatpush1.msra.mxu0 %v226_v8  ;;  %v210_v24 = vld [vmem:[#allocation5 + $0x40] sm:$0xff]  ;;  %v209_v25 = vld [vmem:[#allocation5 + $0x38] sm:$0xff]  ;;  %v208_v26 = vld [vmem:[#allocation5 + $0x30] sm:$0xff] }
  0x51   : > { %254 = vmatprep.subr.mxu0 %v225_v9  ;;  %v207_v27 = vld [vmem:[#allocation5 + $0x28] sm:$0xff]  ;;  %v206_v28 = vld [vmem:[#allocation5 + $0x20] sm:$0xff]  ;;  %v205_v29 = vld [vmem:[#allocation5 + $0x18] sm:$0xff]  ;;  %p572_p13 = por %p571_p2, %p570_p10 }
  0x52   : > { %255 = vmatpush1.msra.mxu0 %v224_v10  ;;  %v204_v30 = vld [vmem:[#allocation5 + $0x10] sm:$0xff]  ;;  %v203_v31 = vld [vmem:[#allocation5 + $0x8] sm:$0xff]  ;;  %v202_v32 = vld [vmem:[#allocation5] sm:$0xff] }
  0x53   : > { %256 = vmatprep.subr.mxu0 %v223_v11  ;;  %v201_v33 = vld [vmem:[%s772_s27] sm:$0xff]  ;;  %p573_p0 = pnand %p572_p13, %p566_p7 }
  0x54   : > { %257 = vmatpush1.msra.mxu0 %v222_v12  ;;  %v234_v37 = vld [vmem:[%s825_s2] sm:$0x3] }
  0x55   : > { %258 = vmatprep.subr.mxu0 %v221_v13  ;;  %v239_v38 = vrot.slane %v234_v37, %v238_v36  ;;  %v243_v43 = vrot.slane %v234_v37, %v242_v42 }
  0x56   : > { %259 = vmatpush1.msra.mxu0 %v220_v14 }
  0x57   : > { %260 = vmatprep.subr.mxu0 %v219_v15 }
  0x58   : > { %261 = vmatpush1.msra.mxu0 %v218_v16 }
  0x59   : > { %262 = vmatprep.subr.mxu0 %v217_v17 }
  0x5a   : > { %263 = vmatpush1.msra.mxu0 %v216_v18 }
  0x5b   : > { %264 = vmatprep.subr.mxu0 %v215_v19 }
  0x5c   : > { %265 = vmatpush1.msra.mxu0 %v214_v20 }
  0x5d   : > { %266 = vmatprep.subr.mxu0 %v213_v21 }
  0x5e   : > { %267 = vmatpush1.msra.mxu0 %v212_v22 }
  0x5f   : > { %268 = vmatprep.subr.mxu0 %v211_v23 }
  0x60   : > { %269 = vmatpush1.msra.mxu0 %v210_v24 }
  0x61   : > { %270 = vmatprep.subr.mxu0 %v209_v25 }
  0x62   : > { %271 = vmatpush1.msra.mxu0 %v208_v26 }
  0x63   : > { %272 = vmatprep.subr.mxu0 %v207_v27 }
  0x64   : > { %273 = vmatpush1.msra.mxu0 %v206_v28 }
  0x65   : > { %274 = vmatprep.subr.mxu0 %v205_v29 }
  0x66   : > { %275 = vmatpush1.msra.mxu0 %v204_v30 }
  0x67   : > { %276 = vmatprep.subr.mxu0 %v203_v31 }
  0x68   : > { %277 = vmatpush1.msra.mxu0 %v202_v32 }
  0x69   : > { %311 = vmatmul.mubr.f32.vlgmr.msra.gmra.mxu0 %v201_v33 }
 0x129   : > { %v312_v39 = vpop.f32.mrf.mxu0 }
 0x12a   : > { %v313_v40 = vadd.f32 %v312_v39, %v239_v38 }
 0x12b   : > { %v314_v44 = vpop.f32.mrf.mxu0 }
 0x12c   : > { %v436_v41 = vmul.f32 -1.442695, %v313_v40  ;;  %v315_v45 = vadd.f32 %v314_v44, %v243_v43 }
 0x12e   : > { %501 = vpow2.f32 %v436_v41 }
 0x12f   : > { %503 = vtanh.f32 %v315_v45 }
 0x13b   : > { %v502_v46 = vpop.eup %501 }
 0x13c   : > { %v320_v47 = vadd.f32 1.0, %v502_v46  ;;  %v504_v48 = vpop.eup %503 }
 0x13e   : > { %505 = vrcp.f32 %v320_v47 }
 0x14b   : > { %v506_v49 = vpop.eup %505 }
 0x14c   : > { %v324_v50 = vmul.f32 %v506_v49, %v504_v48 }
 0x14e   : > { %v325_v51 = vmul.f32 %v324_v50, %v324_v50 }
 0x150   : > { %326 = vadd.xlane.f32.xlu0 %v325_v51 }
 0x1d9   : > { %v327_v52 = vpop.xlane.xlu0 %326 }
 0x1da   : > { %v328_v53 = vmax.f32 %v327_v52, 1e-24 }
 0x1dc   : > { %507 = vrsqrt.f32 %v328_v53 }
 0x1e9   : > { %v508_v54 = vpop.eup %507 }
 0x1ea   : > { %v330_v55 = vmul.f32 %v508_v54, %v324_v50 }
 0x1ec   : > { %331 = vst [vmem:[%s200_s22] sm:$0xff] %v330_v55 }
 0x1ed   : > { %576 = shalt.err (!%p573_p0)
}
 0x1ee   : > { %s577_s9 = scalar_lea.hbm %s344_s29, 128  ;;  %s581_s21 = scalar_lea.hbm %s826_s3, 256 }
 0x1ef   : > { %p578_p5 = scmp.ne.s32.totalorder %s344_s29, %s577_s9  ;;  %p582_p1 = scmp.lt.s32.totalorder %s344_s29, %s826_s3 }
 0x1f0   : > { %p583_p4 = scmp.lt.s32.totalorder %s581_s21, %s577_s9 }
 0x1f1   : > { %p579_p9 = pnand %p578_p5, %p842_p3 }
 0x1f2   : > { %p584_p6 = por %p583_p4, %p582_p1 }
 0x1f3   : > { %p580_p12 = pneg %p579_p9 }
 0x1f5   : > { %p585_p8 = pnand %p584_p6, %p580_p12 }
 0x1f7   : > { %588 = shalt.err (!%p585_p8)
}
 0x1f8   : > { %447 = dma.vmem_to_hbm [thread:$0]  (%p842_p3), %s347_s23, 128, %s344_s29, %s333_s30  }
 0x1f9 PF: > { %s358_s18 = sand.u32 1, %s619_s12   ;;  %p843_p11 = scmp.ne.s32.totalorder %s832_s19, 0 }
 0x1fa   : > { %p844_p7 = scmp.ge.s32.totalorder %s631_s15, 2  ;;  %s359_s20 = scalar_lea.sflag [#allocation4], %s358_s18 }
 0x1fc   : > { %p458_p10 = pnand %p844_p7, %p843_p11 }
 0x1fe   : > { %p459_p2 = pneg %p458_p10 }
 0x200   : > { %614 = dma.done.wait (%p459_p2), %s359_s20, 128  }
 0x201   : > { %616 = vsyncadd (%p459_p2), %s359_s20, 4294967168  ;;  %p17_p13 = scmp.ge.s32.totalorder %s713_s24, 4   ;;  %s845_s12 = smov %s623_s13 }
 0x202   : > { %s846_s13 = smov %s627_s14  ;;  %s847_s14 = smov %s730_s5 }
 0x203   : > { %s848_s15 = smov %s713_s24  ;;  %19 = sbr.rel (!%p17_p13) target bundleno = 6 (0x6), region = 81 }
 0x208   :  { %364 = vsyncpa [#allocation3], 1 }
 0x209   :  { %366 = vsyncpa [#allocation3 + $0x1], 1 }
 0x20a   :  { %367 = vsyncpa [#allocation6], 1 }
 0x20b   :  { %368 = vsyncpa [#allocation4], 1 }
 0x20c   :  { %370 = vsyncpa [#allocation4 + $0x1], 1 }

// kernel: tpu_custom_call.1
= control target key start
LH: loop header
LB: loop body
LE: loop exit
PB: predicated region body
PF: predicated region fallthrough
CT: control target
= control target key end

     0   :  { %8 = vsyncpa [#allocation3], 0  ;;  %s823_s0 = inlined_call_operand.hbm [shape: f32[16,128], index: 0, kind: input, shape index: {}]   ;;  %s824_s1 = inlined_call_operand.hbm [shape: f32[128,256], index: 1, kind: input, shape index: {}]   ;;  %s825_s2 = inlined_call_operand.vmem [shape: f32[1,256], index: 2, kind: input, shape index: {}]   ;;  %s826_s3 = inlined_call_operand.hbm [shape: f32[16,128], index: 3, kind: output, shape index: {}]  }
   0x1   :  { %10 = vsyncpa [#allocation3 + $0x1], 0 }
   0x2   :  { %11 = vsyncpa [#allocation6], 0 }
   0x3   :  { %12 = vsyncpa [#allocation4], 0 }
   0x4   :  { %14 = vsyncpa [#allocation4 + $0x1], 0  ;;  %s659_s12 = smov 0   ;;  %s661_s13 = smov 0  }
   0x5   :  { %s663_s14 = smov 0   ;;  %s665_s15 = smov 0  }
   0x6 LB: > { %s680_s16 = sadd.s32 4294967295, %s631_s15   ;;  %s426_s17 = sadd.s32 4294967294, %s631_s15   ;;  %s631_s15 = sphi %s665_s15, %s848_s15   ;;  %s627_s14 = sphi %s663_s14, %s847_s14   ;;  %s623_s13 = sphi %s661_s13, %s846_s13   ;;  %s619_s12 = sphi %s659_s12, %s845_s12  }
   0x7   : > { %p40_p0 = scmp.ne.s32.totalorder %s623_s13, %s619_s12  ;;  %p827_p1 = scmp.eq.s32.totalorder %s680_s16, 0 }
   0x8   : > { %p112_p3 = scmp.eq.s32.totalorder %s426_s17, 1  ;;  %p427_p5 = scmp.ge.s32.totalorder %s631_s15, 1 }
   0x9   : > { %p689_p4 = por %p827_p1, %p40_p0  ;;  %p119_p7 = scmp.lt.s32.totalorder %s631_s15, 3 }
   0xa   : > { %p694_p6 = por %p112_p3, %p40_p0  ;;  %s633_s21 = smov [#allocation5]  }
   0xb   : > { %s831_s18 = scalar_select %p689_p4, 1, 0 }
   0xc   : > { %s832_s19 = scalar_select %p694_p6, 1, 0 }
   0xd   : > { %p699_p8 = pnand %p427_p5, %p119_p7  ;;  %s131_s22 = sshll.u32 %s633_s21, 4  ;;  %s132_s22 = int_to_ptr.vmem [resolvable:$true] %s131_s22 }
   0xe   : > { %s713_s24 = sadd.s32 1, %s631_s15   ;;  %s27_s25 = sadd.s32 1, %s627_s14 }
   0xf   : > { %s833_s20 = scalar_select %p699_p8, 1, 0 }
  0x10   : > { %p449_p9 = pneg %p699_p8  ;;  %s24_s26 = ssub.s32 %s631_s15, %s713_s24 }
  0x11   : > { %s520_s27 = scalar_lea.vmem %s132_s22, 4096  ;;  %p528_p5 = scmp.lt.s32.totalorder %s132_s22, %s132_s22 }
  0x12   : > { %p708_p11 = pnand %p449_p9, %p827_p1  ;;  %p521_p13 = scmp.ne.s32.totalorder %s132_s22, %s520_s27 }
  0x13   : > { %p529_p7 = scmp.lt.s32.totalorder %s520_s27, %s520_s27 }
  0x14   : > { %p511_p12 = pneg %p708_p11 }
  0x15   : > { %p530_p10 = por %p529_p7, %p528_p5 }
  0x16   : > { %p523_p0 = pnand %p521_p13, %p511_p12 }
  0x18   : > { %p524_p3 = pneg %p523_p0 }
  0x1a   : > { %p531_p2 = pnand %p530_p10, %p524_p3 }
  0x1c   : > { %534 = shalt.err (!%p531_p2)
}
  0x1d   : > { %s634_s28 = smov 256   ;;  %s635_s29 = smov 16  }
  0x1e   : > { %452 = dma.hbm_to_vmem [thread:$0]  (!%p708_p11), %s824_s1, 4096, %s132_s22, [#allocation6], %s634_s28, %s634_s28, %s635_s29  }
  0x1f   : > { %p25_p9 = scmp.eq.s32.totalorder %s24_s26, 0  ;;  %p34_p12 = scmp.ne.s32.totalorder %s627_s14, %s623_s13 }
  0x20   : > { %p35_p10 = scmp.eq.s32.totalorder %s631_s15, 0  ;;  %p462_p2 = scmp.lt.s32.totalorder %s631_s15, 2 }
  0x21   : > { %s730_s5 = scalar_select %p25_p9, %s627_s14, %s27_s25  }
  0x22   : > { %p36_p13 = por %p35_p10, %p34_p12  ;;  %p835_p0 = scmp.eq.s32.totalorder %s680_s16, 1 }
  0x23   : > { %s148_s7 = sand.u32 1, %s627_s14   ;;  %s431_s8 = sshll.u32 %s631_s15, 7 }
  0x24   : > { %p734_p3 = por %p835_p0, %p34_p12  ;;  %s430_s9 = sshll.u32 %s148_s7, 3 }
  0x25   : > { %s743_s17 = scalar_lea.hbm %s823_s0, %s431_s8  ;;  %s152_s21 = scalar_lea.vmem [#allocation2], %s430_s9 }
  0x26   : > { %s836_s6 = scalar_select %p734_p3, 1, 0 }
  0x27   : > { %s159_s22 = sshll.u32 %s152_s21, 4  ;;  %p745_p11 = pnand %p462_p2, %p36_p13  ;;  %s160_s22 = int_to_ptr.vmem [resolvable:$true] %s159_s22 }
  0x28   : > { %s149_s25 = scalar_lea.sflag [#allocation3], %s148_s7  ;;  %s535_s26 = scalar_lea.hbm %s743_s17, 128 }
  0x29   : > { %p536_p5 = scmp.ne.s32.totalorder %s743_s17, %s535_s26  ;;  %p537_p7 = pneg %p745_p11 }
  0x2a   : > { %s540_s29 = scalar_lea.hbm %s823_s0, 256  ;;  %p541_p10 = scmp.lt.s32.totalorder %s743_s17, %s823_s0 }
  0x2b   : > { %p538_p9 = pnand %p537_p7, %p536_p5  ;;  %p542_p2 = scmp.lt.s32.totalorder %s540_s29, %s535_s26 }
  0x2d   : > { %p539_p12 = pneg %p538_p9  ;;  %p543_p13 = por %p542_p2, %p541_p10 }
  0x2f   : > { %p544_p0 = pnand %p543_p13, %p539_p12 }
  0x31   : > { %547 = shalt.err (!%p544_p0)
}
  0x32   : > { %s548_s8 = scalar_lea.vmem %s160_s22, 128  ;;  %s636_s7 = smov [#allocation2]  }
  0x33   : > { %p549_p1 = scmp.ne.s32.totalorder %s160_s22, %s548_s8  ;;  %s553_s9 = sshll.u32 %s636_s7, 4  ;;  %s554_s9 = int_to_ptr.vmem [resolvable:$false] %s553_s9 }
  0x34   : > { %s555_s10 = scalar_lea.vmem %s554_s9, 256  ;;  %p556_p5 = scmp.lt.s32.totalorder %s160_s22, %s554_s9 }
  0x35   : > { %p551_p6 = pnand %p549_p1, %p537_p7  ;;  %p557_p9 = scmp.lt.s32.totalorder %s555_s10, %s548_s8 }
  0x37   : > { %p552_p3 = pneg %p551_p6  ;;  %p558_p4 = por %p557_p9, %p556_p5 }
  0x39   : > { %p559_p8 = pnand %p558_p4, %p552_p3 }
  0x3b   : > { %562 = shalt.err (!%p559_p8)
}
  0x3c   : > { %456 = dma.hbm_to_vmem [thread:$0]  (!%p745_p11), %s743_s17, 128, %s160_s22, %s149_s25  }
  0x3d   : > { %p838_p12 = scmp.ne.s32.totalorder %s833_s20, 0 }
  0x3e   : > { %s766_s11 = sand.u32 (!%p838_p12), 1, %s623_s13   ;;  %p839_p1 = scmp.ne.s32.totalorder (!%p838_p12), %s831_s18, 0 }
  0x3f   : > { %168 = sbr.rel (%p838_p12) target bundleno = 505 (0x1f9), region = 32  ;;  %s433_s21 = sshll.u32 (!%p838_p12), %s766_s11, 3 }
  0x40   : > { %s171_s26 = scalar_lea.sflag (!%p838_p12), [#allocation3], %s766_s11  ;;  %s772_s27 = scalar_lea.vmem (!%p838_p12), [#allocation2], %s433_s21 }
  0x44   : > { %606 = dma.done.wait (%p839_p1), %s171_s26, 128  }
  0x45   : > { %608 = vsyncadd (%p839_p1), %s171_s26, 4294967168  ;;  %p840_p4 = scmp.eq.s32.totalorder %s680_s16, 0 }
  0x47   : > { %610 = dma.done.wait (%p840_p4), [#allocation6], 4096   ;;  %p841_p6 = pmov %p840_p4 }
  0x48   : > { %v637_v0 = vmov 0.0   ;;  %v233_v1 = vld [vmem:[#allocation5 + $0xf8] sm:$0xff]  ;;  %v232_v2 = vld [vmem:[#allocation5 + $0xf0] sm:$0xff]  ;;  %v231_v3 = vld [vmem:[#allocation5 + $0xe8] sm:$0xff]  ;;  %v236_v34 = vlaneseq  ;;  %s438_s17 = sshll.u32 %s680_s16, 7  ;;  %s200_s22 = scalar_lea.vmem [#allocation7], %s433_s21 }
  0x49   : > { %612 = vsyncadd (%p841_p6), [#allocation6], 4294963200  ;;  %310 = vmatprep.mubr.f32.mxu0 %v637_v0  ;;  %246 = vmatprep.subr.mxu0 %v233_v1  ;;  %v230_v4 = vld [vmem:[#allocation5 + $0xe0] sm:$0xff]  ;;  %v229_v5 = vld [vmem:[#allocation5 + $0xd8] sm:$0xff]  ;;  %s346_s23 = sshll.u32 %s200_s22, 4  ;;  %s344_s29 = scalar_lea.hbm %s826_s3, %s438_s17  ;;  %s347_s23 = int_to_ptr.vmem [resolvable:$true] %s346_s23 }
  0x4a   : > { %247 = vmatpush1.msra.mxu0 %v232_v2  ;;  %v228_v6 = vld [vmem:[#allocation5 + $0xd0] sm:$0xff]  ;;  %v227_v7 = vld [vmem:[#allocation5 + $0xc8] sm:$0xff]  ;;  %v226_v8 = vld [vmem:[#allocation5 + $0xc0] sm:$0xff]  ;;  %v237_v35 = vshrl.u32 %v236_v34, 7  ;;  %s333_s30 = scalar_lea.sflag [#allocation4], %s766_s11  ;;  %s563_s4 = scalar_lea.vmem %s347_s23, 128 }
  0x4b   : > { %248 = vmatprep.subr.mxu0 %v231_v3  ;;  %v225_v9 = vld [vmem:[#allocation5 + $0xb8] sm:$0xff]  ;;  %v224_v10 = vld [vmem:[#allocation5 + $0xb0] sm:$0xff]  ;;  %v223_v11 = vld [vmem:[#allocation5 + $0xa8] sm:$0xff]  ;;  %p564_p8 = scmp.ne.s32.totalorder %s347_s23, %s563_s4  ;;  %p842_p3 = scmp.ne.s32.totalorder %s836_s6, 0 }
  0x4c   : > { %249 = vmatpush1.msra.mxu0 %v230_v4  ;;  %v222_v12 = vld [vmem:[#allocation5 + $0xa0] sm:$0xff]  ;;  %v221_v13 = vld [vmem:[#allocation5 + $0x98] sm:$0xff]  ;;  %v220_v14 = vld [vmem:[#allocation5 + $0x90] sm:$0xff]  ;;  %v238_v36 = vsub.s32 0, %v237_v35  ;;  %v242_v42 = vsub.s32 1, %v237_v35  ;;  %s638_s8 = smov [#allocation7]  }
  0x4d   : > { %250 = vmatprep.subr.mxu0 %v229_v5  ;;  %v219_v15 = vld [vmem:[#allocation5 + $0x88] sm:$0xff]  ;;  %v218_v16 = vld [vmem:[#allocation5 + $0x80] sm:$0xff]  ;;  %v217_v17 = vld [vmem:[#allocation5 + $0x78] sm:$0xff]  ;;  %p565_p11 = pnand %p564_p8, %p842_p3  ;;  %s567_s7 = sshll.u32 %s638_s8, 4  ;;  %s568_s7 = int_to_ptr.vmem [resolvable:$false] %s567_s7 }
  0x4e   : > { %251 = vmatpush1.msra.mxu0 %v228_v6  ;;  %v216_v18 = vld [vmem:[#allocation5 + $0x70] sm:$0xff]  ;;  %v215_v19 = vld [vmem:[#allocation5 + $0x68] sm:$0xff]  ;;  %v214_v20 = vld [vmem:[#allocation5 + $0x60] sm:$0xff]  ;;  %s569_s16 = scalar_lea.vmem %s568_s7, 256  ;;  %p570_p10 = scmp.lt.s32.totalorder %s347_s23, %s568_s7 }
  0x4f   : > { %252 = vmatprep.subr.mxu0 %v227_v7  ;;  %v213_v21 = vld [vmem:[#allocation5 + $0x58] sm:$0xff]  ;;  %v212_v22 = vld [vmem:[#allocation5 + $0x50] sm:$0xff]  ;;  %v211_v23 = vld [vmem:[#allocation5 + $0x48] sm:$0xff]  ;;  %p566_p7 = pneg %p565_p11  ;;  %p571_p2 = scmp.lt.s32.totalorder %s569_s16, %s563_s4 }
  0x50   : > { %253 = vmatpush1.msra.mxu0 %v226_v8  ;;  %v210_v24 = vld [vmem:[#allocation5 + $0x40] sm:$0xff]  ;;  %v209_v25 = vld [vmem:[#allocation5 + $0x38] sm:$0xff]  ;;  %v208_v26 = vld [vmem:[#allocation5 + $0x30] sm:$0xff] }
  0x51   : > { %254 = vmatprep.subr.mxu0 %v225_v9  ;;  %v207_v27 = vld [vmem:[#allocation5 + $0x28] sm:$0xff]  ;;  %v206_v28 = vld [vmem:[#allocation5 + $0x20] sm:$0xff]  ;;  %v205_v29 = vld [vmem:[#allocation5 + $0x18] sm:$0xff]  ;;  %p572_p13 = por %p571_p2, %p570_p10 }
  0x52   : > { %255 = vmatpush1.msra.mxu0 %v224_v10  ;;  %v204_v30 = vld [vmem:[#allocation5 + $0x10] sm:$0xff]  ;;  %v203_v31 = vld [vmem:[#allocation5 + $0x8] sm:$0xff]  ;;  %v202_v32 = vld [vmem:[#allocation5] sm:$0xff] }
  0x53   : > { %256 = vmatprep.subr.mxu0 %v223_v11  ;;  %v201_v33 = vld [vmem:[%s772_s27] sm:$0xff]  ;;  %p573_p0 = pnand %p572_p13, %p566_p7 }
  0x54   : > { %257 = vmatpush1.msra.mxu0 %v222_v12  ;;  %v234_v37 = vld [vmem:[%s825_s2] sm:$0x3] }
  0x55   : > { %258 = vmatprep.subr.mxu0 %v221_v13  ;;  %v239_v38 = vrot.slane %v234_v37, %v238_v36  ;;  %v243_v43 = vrot.slane %v234_v37, %v242_v42 }
  0x56   : > { %259 = vmatpush1.msra.mxu0 %v220_v14 }
  0x57   : > { %260 = vmatprep.subr.mxu0 %v219_v15 }
  0x58   : > { %261 = vmatpush1.msra.mxu0 %v218_v16 }
  0x59   : > { %262 = vmatprep.subr.mxu0 %v217_v17 }
  0x5a   : > { %263 = vmatpush1.msra.mxu0 %v216_v18 }
  0x5b   : > { %264 = vmatprep.subr.mxu0 %v215_v19 }
  0x5c   : > { %265 = vmatpush1.msra.mxu0 %v214_v20 }
  0x5d   : > { %266 = vmatprep.subr.mxu0 %v213_v21 }
  0x5e   : > { %267 = vmatpush1.msra.mxu0 %v212_v22 }
  0x5f   : > { %268 = vmatprep.subr.mxu0 %v211_v23 }
  0x60   : > { %269 = vmatpush1.msra.mxu0 %v210_v24 }
  0x61   : > { %270 = vmatprep.subr.mxu0 %v209_v25 }
  0x62   : > { %271 = vmatpush1.msra.mxu0 %v208_v26 }
  0x63   : > { %272 = vmatprep.subr.mxu0 %v207_v27 }
  0x64   : > { %273 = vmatpush1.msra.mxu0 %v206_v28 }
  0x65   : > { %274 = vmatprep.subr.mxu0 %v205_v29 }
  0x66   : > { %275 = vmatpush1.msra.mxu0 %v204_v30 }
  0x67   : > { %276 = vmatprep.subr.mxu0 %v203_v31 }
  0x68   : > { %277 = vmatpush1.msra.mxu0 %v202_v32 }
  0x69   : > { %311 = vmatmul.mubr.f32.vlgmr.msra.gmra.mxu0 %v201_v33 }
 0x129   : > { %v312_v39 = vpop.f32.mrf.mxu0 }
 0x12a   : > { %v313_v40 = vadd.f32 %v312_v39, %v239_v38 }
 0x12b   : > { %v314_v44 = vpop.f32.mrf.mxu0 }
 0x12c   : > { %v436_v41 = vmul.f32 -1.442695, %v313_v40  ;;  %v315_v45 = vadd.f32 %v314_v44, %v243_v43 }
 0x12e   : > { %501 = vpow2.f32 %v436_v41 }
 0x12f   : > { %503 = vtanh.f32 %v315_v45 }
 0x13b   : > { %v502_v46 = vpop.eup %501 }
 0x13c   : > { %v320_v47 = vadd.f32 1.0, %v502_v46  ;;  %v504_v48 = vpop.eup %503 }
 0x13e   : > { %505 = vrcp.f32 %v320_v47 }
 0x14b   : > { %v506_v49 = vpop.eup %505 }
 0x14c   : > { %v324_v50 = vmul.f32 %v506_v49, %v504_v48 }
 0x14e   : > { %v325_v51 = vmul.f32 %v324_v50, %v324_v50 }
 0x150   : > { %326 = vadd.xlane.f32.xlu0 %v325_v51 }
 0x1d9   : > { %v327_v52 = vpop.xlane.xlu0 %326 }
 0x1da   : > { %v328_v53 = vmax.f32 %v327_v52, 1e-24 }
 0x1dc   : > { %507 = vrsqrt.f32 %v328_v53 }
 0x1e9   : > { %v508_v54 = vpop.eup %507 }
 0x1ea   : > { %v330_v55 = vmul.f32 %v508_v54, %v324_v50 }
 0x1ec   : > { %331 = vst [vmem:[%s200_s22] sm:$0xff] %v330_v55 }
 0x1ed   : > { %576 = shalt.err (!%p573_p0)
}
 0x1ee   : > { %s577_s9 = scalar_lea.hbm %s344_s29, 128  ;;  %s581_s21 = scalar_lea.hbm %s826_s3, 256 }
 0x1ef   : > { %p578_p5 = scmp.ne.s32.totalorder %s344_s29, %s577_s9  ;;  %p582_p1 = scmp.lt.s32.totalorder %s344_s29, %s826_s3 }
 0x1f0   : > { %p583_p4 = scmp.lt.s32.totalorder %s581_s21, %s577_s9 }
 0x1f1   : > { %p579_p9 = pnand %p578_p5, %p842_p3 }
 0x1f2   : > { %p584_p6 = por %p583_p4, %p582_p1 }
 0x1f3   : > { %p580_p12 = pneg %p579_p9 }
 0x1f5   : > { %p585_p8 = pnand %p584_p6, %p580_p12 }
 0x1f7   : > { %588 = shalt.err (!%p585_p8)
}
 0x1f8   : > { %447 = dma.vmem_to_hbm [thread:$0]  (%p842_p3), %s347_s23, 128, %s344_s29, %s333_s30  }
 0x1f9 PF: > { %s358_s18 = sand.u32 1, %s619_s12   ;;  %p843_p11 = scmp.ne.s32.totalorder %s832_s19, 0 }
 0x1fa   : > { %p844_p7 = scmp.ge.s32.totalorder %s631_s15, 2  ;;  %s359_s20 = scalar_lea.sflag [#allocation4], %s358_s18 }
 0x1fc   : > { %p458_p10 = pnand %p844_p7, %p843_p11 }
 0x1fe   : > { %p459_p2 = pneg %p458_p10 }
 0x200   : > { %614 = dma.done.wait (%p459_p2), %s359_s20, 128  }
 0x201   : > { %616 = vsyncadd (%p459_p2), %s359_s20, 4294967168  ;;  %p17_p13 = scmp.ge.s32.totalorder %s713_s24, 4   ;;  %s845_s12 = smov %s623_s13 }
 0x202   : > { %s846_s13 = smov %s627_s14  ;;  %s847_s14 = smov %s730_s5 }
 0x203   : > { %s848_s15 = smov %s713_s24  ;;  %19 = sbr.rel (!%p17_p13) target bundleno = 6 (0x6), region = 81 }
 0x208   :  { %364 = vsyncpa [#allocation3], 1 }
 0x209   :  { %366 = vsyncpa [#allocation3 + $0x1], 1 }
 0x20a   :  { %367 = vsyncpa [#allocation6], 1 }
 0x20b   :  { %368 = vsyncpa [#allocation4], 1 }
 0x20c   :  { %370 = vsyncpa [#allocation4 + $0x1], 1 }

</bundles_post_ra>
